<compile_context>
chip_gen: v5e
topology: v5e:2x2
jax: 0.10.0
libtpu: 0.0.40
codegen_flags: <defaults>
</compile_context>

<pallas_src>
import jax
import jax.numpy as jnp
from jax.experimental import pallas as pl
from jax.experimental.pallas import tpu as pltpu


def _content_loss_kernel(x_ref, t_ref, corr_ref, sums_ref, acc_ref):
    k = pl.program_id(0)

    @pl.when(k == 0)
    def _init():
        corr_ref[...] = jnp.zeros_like(corr_ref)
        acc_ref[0] = jnp.float32(0.0)
        acc_ref[1] = jnp.float32(0.0)
        acc_ref[2] = jnp.float32(0.0)

    x = x_ref[...]                      # (N, TK), native dtype (f32 or bf16)
    t = t_ref[...]                      # (N, TK)

    # MXU: corr[i, j] += sum_k x[i, k] * t[j, k]  (== conv2d(input, weight=target))
    corr_ref[...] += jax.lax.dot_general(
        x, t, (((1,), (1,)), ((), ())), preferred_element_type=jnp.float32)

    # VPU/XLU reductions in f32 (upcast only here; HBM traffic stays native dtype).
    xf = x.astype(jnp.float32)
    tf = t.astype(jnp.float32)
    diff = xf - tf
    acc_ref[0] += jnp.sum(diff * diff)  # SSE for MSE (kept diff-based: no cancellation)
    acc_ref[1] += jnp.sum(xf * xf)      # ||input||_F^2
    acc_ref[2] += jnp.sum(tf * tf)      # ||target||_F^2

    @pl.when(k == pl.num_programs(0) - 1)
    def _finalize():
        sums_ref[0] = acc_ref[0]
        sums_ref[1] = acc_ref[1]
        sums_ref[2] = acc_ref[2]


def _choose_tk(n, k, itemsize, block_budget_bytes=8 << 20):
    # 2 inputs x 2 pipeline buffers of (n, tk) must fit the block budget.
    max_tk = block_budget_bytes // max(1, 4 * n * itemsize)
    tk = min(k, max_tk, 16384)
    tk = max(128, (tk // 128) * 128)
    return int(tk)


def content_loss_forward(x, target, *, tk=None):
    """Returns (input_unchanged, stats_dict) mirroring the module's attributes."""
    N, C, H, W = x.shape
    K = C * H * W
    xf = x.reshape(N, K)
    tf = target.reshape(N, K)

    itemsize = jnp.dtype(x.dtype).itemsize
    if tk is None:
        tk = _choose_tk(N, K, itemsize)

    # Pad K to a multiple of tk: zeros leave corr, SSE and the norms unchanged.
    kt = pl.cdiv(K, tk)
    K_pad = kt * tk
    if K_pad != K:
        pad = ((0, 0), (0, K_pad - K))
        xf = jnp.pad(xf, pad)
        tf = jnp.pad(tf, pad)

    # VMEM budget: 2 inputs x 2 pipeline buffers x (N, tk) block + resident corr + headroom.
    vmem_limit_bytes = max(32 << 20, 8 * N * tk * itemsize + N * N * 4 + (8 << 20))

    cost = pl.CostEstimate(
        flops=2 * N * N * K_pad + 6 * N * K_pad,
        transcendentals=0,
        bytes_accessed=2 * N * K_pad * itemsize + N * N * 4 + 3 * 4,
    )

    corr, sums = pl.pallas_call(
        _content_loss_kernel,
        out_shape=(
            jax.ShapeDtypeStruct((N, N), jnp.float32),
            jax.ShapeDtypeStruct((3,), jnp.float32),
        ),
        grid=(kt,),
        in_specs=[
            pl.BlockSpec((N, tk), lambda k: (0, k)),
            pl.BlockSpec((N, tk), lambda k: (0, k)),
        ],
        out_specs=(
            # Constant block index across the reduction axis -> VMEM-resident accumulator.
            pl.BlockSpec((N, N), lambda k: (0, 0)),
            pl.BlockSpec(memory_space=pltpu.MemorySpace.SMEM),
        ),
        scratch_shapes=[pltpu.SMEM((3,), jnp.float32)],
        compiler_params=pltpu.CompilerParams(
            dimension_semantics=("arbitrary",),
            vmem_limit_bytes=int(vmem_limit_bytes),
        ),
        cost_estimate=cost,
    )(xf, tf)

    mse_loss = sums[0] / jnp.float32(N * K)
    norm_input = jnp.sqrt(sums[1])
    norm_target = jnp.sqrt(sums[2])
    corr = jnp.squeeze(corr)            # matches .squeeze() on (N, N, 1, 1)
    fidelity = corr / (norm_input * norm_target)

    stats = dict(loss=mse_loss, corr=corr, norm_input=norm_input,
                 norm_target=norm_target, fidelity=fidelity)
    return x, stats


if __name__ == "__main__":
    key = jax.random.PRNGKey(0)
    k1, k2 = jax.random.split(key)
    # Small shapes consistent with the module: batch=2, channels=4, spatial=16.
    x = jax.random.normal(k1, (2, 4, 16, 16), dtype=jnp.float32)
    # "target" plays the role of the detached target feature map passed to __init__.
    target = jax.random.normal(k2, (2, 4, 16, 16), dtype=jnp.float32)

    # tk=256 -> 4-step K reduction grid: exercises the pipelined accumulation path.
    out, stats = content_loss_forward(x, target, tk=256)
    jax.block_until_ready((out, stats))

    # Pure-JAX reference for correctness check.
    xf = x.reshape(2, -1)
    tf = target.reshape(2, -1)
    ref_corr = xf @ tf.T
    ref_loss = jnp.mean((x - target) ** 2)
    ref_ni = jnp.linalg.norm(xf)
    ref_nt = jnp.linalg.norm(tf)
    ref_fid = ref_corr / (ref_ni * ref_nt)

    assert jnp.allclose(out, x)
    assert jnp.allclose(stats["loss"], ref_loss, rtol=1e-5, atol=1e-5)
    assert jnp.allclose(stats["corr"], ref_corr, rtol=1e-5, atol=1e-3)
    assert jnp.allclose(stats["norm_input"], ref_ni, rtol=1e-5, atol=1e-5)
    assert jnp.allclose(stats["norm_target"], ref_nt, rtol=1e-5, atol=1e-5)
    assert jnp.allclose(stats["fidelity"], ref_fid, rtol=1e-5, atol=1e-6)

    # Also check the auto-tile path (whole-K single step for this toy size).
    out2, stats2 = content_loss_forward(x, target)
    jax.block_until_ready((out2, stats2))
    assert jnp.allclose(stats2["corr"], ref_corr, rtol=1e-5, atol=1e-3)
    assert jnp.allclose(stats2["loss"], ref_loss, rtol=1e-5, atol=1e-5)

    print("KERNEL_OK")
</pallas_src>

<mosaic_0001>
module attributes {stable_mosaic.version = 11 : i64} {
  func.func @_content_loss_kernel(%arg0: i32, %arg1: memref<2x256xf32, #tpu.memory_space<vmem>>, %arg2: memref<2x256xf32, #tpu.memory_space<vmem>>, %arg3: memref<2x2xf32, #tpu.memory_space<vmem>>, %arg4: memref<3xf32, #tpu.memory_space<smem>>, %arg5: memref<3xf32, #tpu.memory_space<smem>>) attributes {dimension_semantics = [#tpu.dimension_semantics<arbitrary>], iteration_bounds = array<i64: 4>, scalar_prefetch = 0 : i64, scratch_operands = 1 : i64, tpu.core_type = #tpu.core_type<tc>, window_params = [{transform_indices = @transform_0, window_bounds = array<i64: 2, 256>}, {transform_indices = @transform_1, window_bounds = array<i64: 2, 256>}, {pipeline_mode = #tpu.pipeline_mode<synchronous>, transform_indices = @transform_2, window_bounds = array<i64: 2, 2>}, {transform_indices = @transform_3, window_bounds = array<i64: 3>}]} {
    %c0_i32 = arith.constant 0 : i32
    %0 = arith.cmpi eq, %arg0, %c0_i32 : i32
    %1 = arith.extui %0 : i1 to i32
    %c0_i32_0 = arith.constant 0 : i32
    %2 = arith.cmpi ne, %1, %c0_i32_0 : i32
    scf.if %2 {
      %cst_16 = arith.constant 0.000000e+00 : f32
      %37 = vector.broadcast %cst_16 : f32 to vector<2x2xf32>
      %c0_17 = arith.constant 0 : index
      %c0_18 = arith.constant 0 : index
      %38 = vector.load %arg3[%c0_17, %c0_18] : memref<2x2xf32, #tpu.memory_space<vmem>>, vector<2x2xf32>
      tpu.vector_store %arg3[%c0_17, %c0_18], %37 {strides = array<i32>} : memref<2x2xf32, #tpu.memory_space<vmem>>, vector<2x2xf32>,
      %cst_19 = arith.constant 0.000000e+00 : f32
      %c0_20 = arith.constant 0 : index
      %39 = memref.load %arg5[%c0_20] : memref<3xf32, #tpu.memory_space<smem>>
      memref.store %cst_19, %arg5[%c0_20] : memref<3xf32, #tpu.memory_space<smem>>
      %cst_21 = arith.constant 0.000000e+00 : f32
      %c1_22 = arith.constant 1 : index
      %40 = memref.load %arg5[%c1_22] : memref<3xf32, #tpu.memory_space<smem>>
      memref.store %cst_21, %arg5[%c1_22] : memref<3xf32, #tpu.memory_space<smem>>
      %cst_23 = arith.constant 0.000000e+00 : f32
      %c2_24 = arith.constant 2 : index
      %41 = memref.load %arg5[%c2_24] : memref<3xf32, #tpu.memory_space<smem>>
      memref.store %cst_23, %arg5[%c2_24] : memref<3xf32, #tpu.memory_space<smem>>
    } else {
    }
    %c0 = arith.constant 0 : index
    %c0_1 = arith.constant 0 : index
    %3 = vector.load %arg1[%c0, %c0_1] : memref<2x256xf32, #tpu.memory_space<vmem>>, vector<2x256xf32>
    %c0_2 = arith.constant 0 : index
    %c0_3 = arith.constant 0 : index
    %4 = vector.load %arg2[%c0_2, %c0_3] : memref<2x256xf32, #tpu.memory_space<vmem>>, vector<2x256xf32>
    %c0_4 = arith.constant 0 : index
    %c0_5 = arith.constant 0 : index
    %5 = vector.load %arg3[%c0_4, %c0_5] : memref<2x2xf32, #tpu.memory_space<vmem>>, vector<2x2xf32>
    %cst = arith.constant dense<0.000000e+00> : vector<2x2xf32>
    %6 = tpu.matmul %3, %4, %cst {dimension_numbers = #tpu.dot_dimension_numbers<[1], [1], [0], [0], [0, 0, 1, 0], [], []>} : vector<2x256xf32>, vector<2x256xf32>, vector<2x2xf32> -> vector<2x2xf32>
    %7 = arith.addf %5, %6 : vector<2x2xf32>
    %c0_6 = arith.constant 0 : index
    %c0_7 = arith.constant 0 : index
    %8 = vector.load %arg3[%c0_6, %c0_7] : memref<2x2xf32, #tpu.memory_space<vmem>>, vector<2x2xf32>
    tpu.vector_store %arg3[%c0_6, %c0_7], %7 {strides = array<i32>} : memref<2x2xf32, #tpu.memory_space<vmem>>, vector<2x2xf32>,
    %9 = arith.subf %3, %4 : vector<2x256xf32>
    %c0_8 = arith.constant 0 : index
    %10 = memref.load %arg5[%c0_8] : memref<3xf32, #tpu.memory_space<smem>>
    %11 = arith.mulf %9, %9 : vector<2x256xf32>
    %12 = vector.shape_cast %11 : vector<2x256xf32> to vector<1x2x256xf32>
    %cst_9 = arith.constant dense<0.000000e+00> : vector<1xf32>
    %13 = vector.multi_reduction <add>, %12, %cst_9 [1, 2] : vector<1x2x256xf32> to vector<1xf32>
    %14 = vector.shape_cast %13 : vector<1xf32> to vector<1x1x1xf32>
    %15 = vector.extract %14[0, 0, 0] : f32 from vector<1x1x1xf32>
    %16 = arith.addf %10, %15 : f32
    %c0_10 = arith.constant 0 : index
    %17 = memref.load %arg5[%c0_10] : memref<3xf32, #tpu.memory_space<smem>>
    memref.store %16, %arg5[%c0_10] : memref<3xf32, #tpu.memory_space<smem>>
    %c1 = arith.constant 1 : index
    %18 = memref.load %arg5[%c1] : memref<3xf32, #tpu.memory_space<smem>>
    %19 = arith.mulf %3, %3 : vector<2x256xf32>
    %20 = vector.shape_cast %19 : vector<2x256xf32> to vector<1x2x256xf32>
    %cst_11 = arith.constant dense<0.000000e+00> : vector<1xf32>
    %21 = vector.multi_reduction <add>, %20, %cst_11 [1, 2] : vector<1x2x256xf32> to vector<1xf32>
    %22 = vector.shape_cast %21 : vector<1xf32> to vector<1x1x1xf32>
    %23 = vector.extract %22[0, 0, 0] : f32 from vector<1x1x1xf32>
    %24 = arith.addf %18, %23 : f32
    %c1_12 = arith.constant 1 : index
    %25 = memref.load %arg5[%c1_12] : memref<3xf32, #tpu.memory_space<smem>>
    memref.store %24, %arg5[%c1_12] : memref<3xf32, #tpu.memory_space<smem>>
    %c2 = arith.constant 2 : index
    %26 = memref.load %arg5[%c2] : memref<3xf32, #tpu.memory_space<smem>>
    %27 = arith.mulf %4, %4 : vector<2x256xf32>
    %28 = vector.shape_cast %27 : vector<2x256xf32> to vector<1x2x256xf32>
    %cst_13 = arith.constant dense<0.000000e+00> : vector<1xf32>
    %29 = vector.multi_reduction <add>, %28, %cst_13 [1, 2] : vector<1x2x256xf32> to vector<1xf32>
    %30 = vector.shape_cast %29 : vector<1xf32> to vector<1x1x1xf32>
    %31 = vector.extract %30[0, 0, 0] : f32 from vector<1x1x1xf32>
    %32 = arith.addf %26, %31 : f32
    %c2_14 = arith.constant 2 : index
    %33 = memref.load %arg5[%c2_14] : memref<3xf32, #tpu.memory_space<smem>>
    memref.store %32, %arg5[%c2_14] : memref<3xf32, #tpu.memory_space<smem>>
    %c3_i32 = arith.constant 3 : i32
    %34 = arith.cmpi eq, %arg0, %c3_i32 : i32
    %35 = arith.extui %34 : i1 to i32
    %c0_i32_15 = arith.constant 0 : i32
    %36 = arith.cmpi ne, %35, %c0_i32_15 : i32
    scf.if %36 {
      %c0_16 = arith.constant 0 : index
      %37 = memref.load %arg5[%c0_16] : memref<3xf32, #tpu.memory_space<smem>>
      %c0_17 = arith.constant 0 : index
      %38 = memref.load %arg4[%c0_17] : memref<3xf32, #tpu.memory_space<smem>>
      memref.store %37, %arg4[%c0_17] : memref<3xf32, #tpu.memory_space<smem>>
      %c1_18 = arith.constant 1 : index
      %39 = memref.load %arg5[%c1_18] : memref<3xf32, #tpu.memory_space<smem>>
      %c1_19 = arith.constant 1 : index
      %40 = memref.load %arg4[%c1_19] : memref<3xf32, #tpu.memory_space<smem>>
      memref.store %39, %arg4[%c1_19] : memref<3xf32, #tpu.memory_space<smem>>
      %c2_20 = arith.constant 2 : index
      %41 = memref.load %arg5[%c2_20] : memref<3xf32, #tpu.memory_space<smem>>
      %c2_21 = arith.constant 2 : index
      %42 = memref.load %arg4[%c2_21] : memref<3xf32, #tpu.memory_space<smem>>
      memref.store %41, %arg4[%c2_21] : memref<3xf32, #tpu.memory_space<smem>>
    } else {
    }
    return
  }
  func.func @transform_0(%arg0: i32) -> (i32, i32) {
    %c0_i32 = arith.constant 0 : i32
    %c0_i32_0 = arith.constant 0 : i32
    return %c0_i32, %arg0 : i32, i32
  }
  func.func @transform_1(%arg0: i32) -> (i32, i32) {
    %c0_i32 = arith.constant 0 : i32
    %c0_i32_0 = arith.constant 0 : i32
    return %c0_i32, %arg0 : i32, i32
  }
  func.func @transform_2(%arg0: i32) -> (i32, i32) {
    %c0_i32 = arith.constant 0 : i32
    %c0_i32_0 = arith.constant 0 : i32
    %c0_i32_1 = arith.constant 0 : i32
    return %c0_i32, %c0_i32_0 : i32, i32
  }
  func.func @transform_3(%arg0: i32) -> i32 {
    %c0_i32 = arith.constant 0 : i32
    %c0_i32_0 = arith.constant 0 : i32
    return %c0_i32 : i32
  }
}

</mosaic_0001>

<bundles_post_ra>
// kernel: tpu_custom_call.1
= control target key start
LH: loop header
LB: loop body
LE: loop exit
PB: predicated region body
PF: predicated region fallthrough
CT: control target
= control target key end

     0   :  { %9 = vsyncpa [#allocation4], 0  ;;  %s903_s0 = inlined_call_operand.hbm [shape: f32[2,1024], index: 0, kind: input, shape index: {}]   ;;  %s904_s1 = inlined_call_operand.hbm [shape: f32[2,1024], index: 1, kind: input, shape index: {}]   ;;  %s905_s2 = inlined_call_operand.hbm [shape: f32[2,2], index: 2, kind: output, shape index: {0}]   ;;  %s906_s3 = inlined_call_operand.hbm [shape: f32[3], index: 3, kind: output, shape index: {1}]  }
   0x1   :  { %11 = vsyncpa [#allocation4 + $0x1], 0 }
   0x2   :  { %12 = vsyncpa [#allocation8], 0 }
   0x3   :  { %14 = vsyncpa [#allocation8 + $0x1], 0 }
   0x4   :  { %15 = vsyncpa [#allocation5], 0 }
   0x5   :  { %16 = vsyncpa [#allocation6], 0  ;;  %s750_s12 = smov 0   ;;  %s752_s13 = smov 0  }
   0x6   :  { %s754_s14 = smov 0   ;;  %s756_s15 = smov 0  }
   0x7 LB: > { %s769_s16 = sadd.s32 4294967295, %s724_s15   ;;  %s772_s17 = sadd.s32 1, %s724_s15   ;;  %s724_s15 = sphi %s756_s15, %s914_s15   ;;  %s720_s14 = sphi %s754_s14, %s913_s14   ;;  %s716_s13 = sphi %s752_s13, %s912_s13   ;;  %s712_s12 = sphi %s750_s12, %s911_s12  }
   0x8   : > { %s26_s18 = ssub.s32 %s724_s15, %s772_s17  ;;  %s29_s19 = sadd.s32 1, %s720_s14 }
   0x9   : > { %p27_p0 = scmp.eq.s32.totalorder %s26_s18, 0  ;;  %p36_p1 = scmp.ne.s32.totalorder %s720_s14, %s716_s13 }
   0xa   : > { %p37_p2 = scmp.eq.s32.totalorder %s724_s15, 0  ;;  %p42_p3 = scmp.ne.s32.totalorder %s716_s13, %s712_s12 }
   0xb   : > { %s782_s20 = scalar_select %p27_p0, %s720_s14, %s29_s19  }
   0xc   : > { %p784_p4 = por %p37_p2, %p36_p1  ;;  %p43_p5 = scmp.eq.s32.totalorder %s769_s16, 0 }
   0xd   : > { %p534_p6 = scmp.lt.s32.totalorder %s724_s15, 4  ;;  %s795_s23 = sand.u32 1, %s720_s14  }
   0xe   : > { %p790_p7 = por %p43_p5, %p42_p3  ;;  %s482_s24 = sshll.u32 %s795_s23, 2 }
   0xf   : > { %s503_s25 = sshll.u32 %s724_s15, 2  ;;  %s138_s29 = scalar_lea.vmem [#allocation3], %s482_s24 }
  0x10   : > { %s143_s28 = scalar_lea.hbm %s903_s0, %s503_s25  ;;  %s147_s30 = sshll.u32 %s138_s29, 4  ;;  %s148_s30 = int_to_ptr.vmem [resolvable:$true] %s147_s30 }
  0x11   : > { %s145_s4 = sshll.u32 %s143_s28, 4  ;;  %p804_p8 = pnand %p534_p6, %p784_p4  ;;  %s146_s4 = int_to_ptr.hbm [resolvable:$true] %s145_s4 }
  0x12   : > { %p488_p9 = scmp.ge.s32.totalorder %s724_s15, 1  ;;  %p172_p10 = scmp.lt.s32.totalorder %s724_s15, 5 }
  0x13   : > { %s135_s6 = scalar_lea.sflag [#allocation4], %s795_s23  ;;  %s576_s7 = sshra.s32 %s146_s4, 4  ;;  %s577_s7 = int_to_ptr.hbm [resolvable:$true] %s576_s7 }
  0x14   : > { %s578_s8 = scalar_lea.hbm %s577_s7, 4  ;;  %p580_p12 = pneg %p804_p8 }
  0x15   : > { %p579_p11 = scmp.ne.s32.totalorder %s577_s7, %s578_s8  ;;  %s583_s11 = scalar_lea.hbm %s903_s0, 16 }
  0x16   : > { %p584_p1 = scmp.lt.s32.totalorder %s577_s7, %s903_s0  ;;  %p585_p2 = scmp.lt.s32.totalorder %s583_s11, %s578_s8 }
  0x17   : > { %p581_p13 = pnand %p580_p12, %p579_p11 }
  0x18   : > { %p586_p3 = por %p585_p2, %p584_p1 }
  0x19   : > { %p582_p0 = pneg %p581_p13 }
  0x1b   : > { %p587_p4 = pnand %p586_p3, %p582_p0 }
  0x1d   : > { %590 = shalt.err (!%p587_p4)
}
  0x1e   : > { %530 = dma.hbm_to_vmem [thread:$0]  (!%p804_p8), %s146_s4, 64, %s148_s30, %s135_s6  }
  0x1f   : > { %p828_p5 = pnand %p488_p9, %p172_p10  ;;  %s163_s27 = scalar_lea.hbm %s904_s1, %s503_s25 }
  0x20   : > { %s158_s28 = scalar_lea.vmem [#allocation7], %s482_s24  ;;  %s165_s7 = sshll.u32 %s163_s27, 4  ;;  %s166_s7 = int_to_ptr.hbm [resolvable:$true] %s165_s7 }
  0x21   : > { %s167_s29 = sshll.u32 %s158_s28, 4  ;;  %s155_s8 = scalar_lea.sflag [#allocation8], %s795_s23  ;;  %s168_s29 = int_to_ptr.vmem [resolvable:$true] %s167_s29 }
  0x22   : > { %s606_s9 = sshra.s32 %s166_s7, 4  ;;  %s613_s4 = scalar_lea.hbm %s904_s1, 16  ;;  %s607_s9 = int_to_ptr.hbm [resolvable:$true] %s606_s9 }
  0x23   : > { %s608_s10 = scalar_lea.hbm %s607_s9, 4  ;;  %p614_p11 = scmp.lt.s32.totalorder %s607_s9, %s904_s1 }
  0x24   : > { %p609_p6 = scmp.ne.s32.totalorder %s607_s9, %s608_s10  ;;  %p615_p13 = scmp.lt.s32.totalorder %s613_s4, %s608_s10 }
  0x26   : > { %p611_p9 = pnand %p609_p6, %p580_p12  ;;  %p616_p0 = por %p615_p13, %p614_p11 }
  0x28   : > { %p612_p10 = pneg %p611_p9 }
  0x2a   : > { %p617_p1 = pnand %p616_p0, %p612_p10 }
  0x2c   : > { %620 = shalt.err (!%p617_p1)
}
  0x2d   : > { %533 = dma.hbm_to_vmem [thread:$0]  (!%p804_p8), %s166_s7, 64, %s168_s29, %s155_s8  }
  0x2e   : > { %176 = sbr.rel (%p828_p5) target bundleno = 295 (0x127), region = 28  ;;  %s178_s23 = sand.u32 (!%p828_p5), 1, %s716_s13  }
  0x2f   : > { %s489_s24 = sshll.u32 (!%p828_p5), %s178_s23, 2  ;;  %s179_s11 = scalar_lea.sflag (!%p828_p5), [#allocation4], %s178_s23 }
  0x30   : > { %s182_s12 = scalar_lea.vmem (!%p828_p5), [#allocation3], %s489_s24 }
  0x33   : > { %695 = dma.done.wait (%p790_p7), %s179_s11, 64  }
  0x34   : > { %697 = vsyncadd (%p790_p7), %s179_s11, 4294967232  ;;  %s189_s18 = scalar_lea.sflag [#allocation8], %s178_s23  ;;  %s192_s21 = scalar_lea.vmem [#allocation7], %s489_s24 }
  0x35   : > { %699 = dma.done.wait (%p790_p7), %s189_s18, 64  }
  0x36   : > { %701 = vsyncadd (%p790_p7), %s189_s18, 4294967232  ;;  %p491_p8 = scmp.ne.s32.totalorder %s769_s16, 0 }
  0x37   : > { %s727_s5 = smov (!%p491_p8), 0.0  }
  0x38   : > { %221 = sbr.rel (%p491_p8) target bundleno = 63 (0x3f), region = 40  ;;  %225 = sst [smem:[#allocation2]] (!%p491_p8), %s727_s5 }
  0x39   : > { %227 = sst [smem:[#allocation2 + $0x1]] (!%p491_p8), %s727_s5 }
  0x3a   : > { %229 = sst [smem:[#allocation2 + $0x2]] (!%p491_p8), %s727_s5 }
  0x3d   : > { %vm222_vm0 = vcmask 9216   ;;  %v726_v0 = vmov 0.0  }
  0x3e   : > { %223 = vst.msk [vmem:[#allocation9] sm:$0x3] %vm222_vm0, %v726_v0 }
  0x3f PF: > { %v230_v1 = vld [vmem:[%s182_s12] sm:$0xf]  ;;  %v231_v2 = vld [vmem:[%s192_s21] sm:$0xf]  ;;  %vm297_vm1 = vcmask 1041408   ;;  %s728_s22 = smov [#allocation9]  }
  0x40   : > { %234 = vst [vmem:[#allocation1] ss:$4 sm:$0xff] %v230_v1  ;;  %v288_v5 = vsub.f32 %v230_v1, %v231_v2  ;;  %v314_v9 = vmul.f32 %v230_v1, %v230_v1  ;;  %v337_v15 = vmul.f32 %v231_v2, %v231_v2  ;;  %s378_s19 = sshll.u32 %s728_s22, 4  ;;  %s380_s28 = sshll.u32 %s905_s2, 4  ;;  %vm286_vm2 = vcmask 9216   ;;  %s379_s19 = int_to_ptr.vmem [resolvable:$true] %s378_s19  ;;  %s381_s28 = int_to_ptr.hbm [resolvable:$true] %s380_s28 }
  0x41   : > { %p535_p7 = scmp.eq.s32.totalorder %s769_s16, 3  ;;  %s289_s29 = sld [smem:[#allocation2]] }
  0x42   : > { %v290_v6 = vmul.f32 %v288_v5, %v288_v5  ;;  %s492_s8 = sld [smem:[#allocation2 + $0x1]]  ;;  %s390_s25 = sshll.u32 %s906_s3, 4  ;;  %s391_s25 = int_to_ptr.hbm [resolvable:$true] %s390_s25 }
  0x43   : > { %s493_s15 = sld [smem:[#allocation2 + $0x2]]  ;;  %s729_s11 = smov [#allocation10]  }
  0x45   : > { %v232_v50 = vld [vmem:[#allocation9] sm:$0x3] }
  0x47   : > { %v235_v3 = vld.sshfl [vmem:[#allocation1] sm:$0xff pattern:$0x73625140]  ;;  %v236_v4 = vld.sshfl [vmem:[#allocation1 + $0x8] sm:$0xff pattern:$0x73625140] }
  0x48   : > { %240 = vst [vmem:[#allocation1] ss:$4 sm:$0xff] %v231_v2 }
  0x4f   : > { %v241_v7 = vld.sshfl [vmem:[#allocation1] sm:$0xff pattern:$0x73625140]  ;;  %v242_v8 = vld.sshfl [vmem:[#allocation1 + $0x8] sm:$0xff pattern:$0x73625140] }
  0x50   : > { %292 = vst [vmem:[#allocation1] ss:$4 sm:$0xff] %v290_v6  ;;  %260 = vmatpush.xpose.msra.mxu0 %v241_v7  ;;  %280 = vmatpush.xpose.msra.mxu1 %v242_v8 }
  0x53   : > { %261 = vmatmul.f32.vlgmr.msra.gmra.mxu0 %v235_v3  ;;  %281 = vmatmul.f32.vlgmr.msra.gmra.mxu1 %v236_v4 }
  0x57   : > { %v293_v10 = vld.sshfl [vmem:[#allocation1] sm:$0xff pattern:$0x73625140]  ;;  %v294_v11 = vld.sshfl [vmem:[#allocation1 + $0x8] sm:$0xff pattern:$0x73625140] }
  0x58   : > { %v298_v12 = vsel %vm297_vm1, %v293_v10, 0.0  ;;  %v299_v13 = vsel %vm297_vm1, %v294_v11, 0.0  ;;  %316 = vst [vmem:[#allocation1] ss:$4 sm:$0xff] %v314_v9 }
  0x59   : > { %v300_v14 = vadd.f32 %v299_v13, %v298_v12 }
  0x5b   : > { %301 = vadd.xlane.f32.xlu0 %v300_v14 }
  0x5f   : > { %v317_v16 = vld.sshfl [vmem:[#allocation1] sm:$0xff pattern:$0x73625140]  ;;  %v318_v17 = vld.sshfl [vmem:[#allocation1 + $0x8] sm:$0xff pattern:$0x73625140] }
  0x60   : > { %v321_v18 = vsel %vm297_vm1, %v317_v16, 0.0  ;;  %v322_v19 = vsel %vm297_vm1, %v318_v17, 0.0  ;;  %339 = vst [vmem:[#allocation1] ss:$4 sm:$0xff] %v337_v15 }
  0x61   : > { %v323_v20 = vadd.f32 %v322_v19, %v321_v18 }
  0x63   : > { %324 = vadd.xlane.f32.xlu0 %v323_v20 }
  0x67   : > { %v340_v21 = vld.sshfl [vmem:[#allocation1] sm:$0xff pattern:$0x73625140]  ;;  %v341_v22 = vld.sshfl [vmem:[#allocation1 + $0x8] sm:$0xff pattern:$0x73625140] }
  0x68   : > { %v344_v23 = vsel %vm297_vm1, %v340_v21, 0.0  ;;  %v345_v24 = vsel %vm297_vm1, %v341_v22, 0.0 }
  0x69   : > { %v346_v25 = vadd.f32 %v345_v24, %v344_v23 }
  0x6b   : > { %347 = vadd.xlane.f32.xlu1 %v346_v25 }
  0xce   : > { %v302_v26 = vpop.xlane.xlu0 %301 }
  0xcf   : > { %v303_v27 = vrot.slane %v302_v26, 4 }
  0xd0   : > { %v262_v47 = vpop.f32.mrf.mxu0  ;;  %v282_v48 = vpop.f32.mrf.mxu1 }
  0xd1   : > { %v304_v28 = vadd.f32 %v303_v27, %v302_v26  ;;  %v283_v49 = vadd.f32 %v282_v48, %v262_v47 }
  0xd3   : > { %v305_v29 = vrot.slane %v304_v28, 2  ;;  %v285_v51 = vadd.f32 %v283_v49, %v232_v50 }
  0xd5   : > { %v306_v30 = vadd.f32 %v305_v29, %v304_v28  ;;  %287 = vst.msk [vmem:[#allocation9] sm:$0x3] %vm286_vm2, %v285_v51 }
  0xd6   : > { %v325_v31 = vpop.xlane.xlu0 %324  ;;  %520 = dma.vmem_to_hbm [thread:$0]  (%p535_p7), %s379_s19, 32, %s381_s28, [#allocation5]  }
  0xd7   : > { %v326_v32 = vrot.slane %v325_v31, 4  ;;  %v307_v33 = vrot.slane %v306_v30, 1 }
  0xd9   : > { %v327_v34 = vadd.f32 %v326_v32, %v325_v31  ;;  %v308_v35 = vadd.f32 %v307_v33, %v306_v30 }
  0xdb   : > { %v328_v36 = vrot.slane %v327_v34, 2  ;;  %505 = vpush %v308_v35 }
  0xdd   : > { %v329_v37 = vadd.f32 %v328_v36, %v327_v34 }
  0xde   : > { %v348_v38 = vpop.xlane.xlu1 %347 }
  0xdf   : > { %v349_v39 = vrot.slane %v348_v38, 4  ;;  %v330_v40 = vrot.slane %v329_v37, 1 }
  0xe1   : > { %v350_v41 = vadd.f32 %v349_v39, %v348_v38  ;;  %v331_v42 = vadd.f32 %v330_v40, %v329_v37 }
  0xe3   : > { %v351_v43 = vrot.slane %v350_v41, 2  ;;  %507 = vpush %v331_v42 }
  0xe5   : > { %v352_v44 = vadd.f32 %v351_v43, %v350_v41 }
  0xe7   : > { %v353_v45 = vrot.slane %v352_v44, 1 }
  0xe9   : > { %v354_v46 = vadd.f32 %v353_v45, %v352_v44 }
  0xeb   : > { %509 = vpush %v354_v46 }
 0x10c   : > { %s506_s7 = spop %505 }
 0x10d   : > { %s310_s9 = sadd.f32 %s506_s7, %s289_s29 }
 0x10f   : > { %312 = sst [smem:[#allocation2]] %s310_s9 }
 0x110   : > { %516 = sst [smem:[#allocation10]] (%p535_p7), %s310_s9 }
 0x114   : > { %s508_s10 = spop %507 }
 0x115   : > { %s333_s30 = sadd.f32 %s508_s10, %s492_s8 }
 0x117   : > { %335 = sst [smem:[#allocation2 + $0x1]] %s333_s30 }
 0x118   : > { %517 = sst [smem:[#allocation10 + $0x1]] (%p535_p7), %s333_s30 }
 0x11c   : > { %s510_s23 = spop %509 }
 0x11d   : > { %s356_s24 = sadd.f32 %s510_s23, %s493_s15 }
 0x11f   : > { %358 = sst [smem:[#allocation2 + $0x2]] %s356_s24 }
 0x120   : > { %518 = sst [smem:[#allocation10 + $0x2]] (%p535_p7), %s356_s24 }
 0x121   : > { %522 = dma.smem_to_hbm (%p535_p7), %s729_s11, 16, %s391_s25, [#allocation6]  }
 0x122   : > { %703 = dma.done.wait (%p535_p7), [#allocation5], 32  }
 0x123   : > { %705 = vsyncadd (%p535_p7), [#allocation5], 4294967264 }
 0x124   : > { %707 = dma.done.wait (%p535_p7), [#allocation6], 16  }
 0x125   : > { %709 = vsyncadd (%p535_p7), [#allocation6], 4294967280 }
 0x126   : > { %404 = sfence }
 0x127 PF: > { %p19_p12 = scmp.ge.s32.totalorder %s772_s17, 6   ;;  %s911_s12 = smov %s716_s13 }
 0x128   : > { %s912_s13 = smov %s720_s14  ;;  %s913_s14 = smov %s782_s20 }
 0x129   : > { %s914_s15 = smov %s772_s17  ;;  %21 = sbr.rel (!%p19_p12) target bundleno = 7 (0x7), region = 104 }
 0x12e   :  { %410 = vsyncpa [#allocation4], 1 }
 0x12f   :  { %412 = vsyncpa [#allocation4 + $0x1], 1 }
 0x130   :  { %413 = vsyncpa [#allocation8], 1 }
 0x131   :  { %415 = vsyncpa [#allocation8 + $0x1], 1 }
 0x132   :  { %416 = vsyncpa [#allocation5], 1 }
 0x133   :  { %418 = vsyncpa [#allocation5 + $0x1], 1 }
 0x134   :  { %419 = vsyncpa [#allocation6], 1 }
 0x135   :  { %421 = vsyncpa [#allocation6 + $0x1], 1 }

</bundles_post_ra>
